<compile_context>
chip_gen: v6e
topology: v6e:2x2x1
jax: 0.10.0
libtpu: 0.0.40
codegen_flags: <defaults>
</compile_context>

<pallas_src>
from functools import partial

import numpy as np
import jax
import jax.numpy as jnp
from jax.experimental import pallas as pl
from jax.experimental.pallas import tpu as pltpu


def _scatter_matrix(K, Hp, Wp, H, W):
    """0/1 matrix S (L, H*W): S[l, p] = 1 iff fold scatters input loc l to pixel p."""
    S = np.zeros((Hp * Wp, H * W), dtype=np.float32)
    for i in range(Hp):
        for j in range(Wp):
            l = i * Wp + j
            for ki in range(K):
                for kj in range(K):
                    S[l, (i + ki) * W + (j + kj)] = 1.0
    return S


def _make_recon_kernel(n_blk):
    """xt_ref: (n, c, L) f32, s_ref: (L, P) bf16, o_ref: (n, c, P) f32."""
    def recon_kernel(xt_ref, s_ref, o_ref):
        # S is exact 0/1 in bf16; upcast ONCE (hoisted out of the unrolled loop)
        # so the MXU matmul runs with f32 inputs and f32 accumulation.
        s = s_ref[...].astype(jnp.float32)                     # (L, P)
        for b in range(n_blk):                                 # static unroll, tiny n
            # (c, L) @ (L, P) -> (c, P); output minor dim P=256 is lane-dense.
            o_ref[b] = jnp.dot(xt_ref[b], s,
                               preferred_element_type=jnp.float32)
    return recon_kernel


@partial(jax.jit, static_argnames=("ch", "resolution", "kernel_size"))
def neural_normal_recon(x, keypoints, *, ch, resolution, kernel_size):
    """x: [n, L, c] f32, keypoints: [n, L, 1] (unused). Returns [n, c, h, w]."""
    del keypoints  # unused, exactly as in the PyTorch module
    n, L, c = x.shape
    K = kernel_size
    H = W = resolution
    Hp, Wp = H - K + 1, W - K + 1          # fold with stride=1, padding=0
    P = H * W
    assert c == ch and L == Hp * Wp, "L must equal (res-k+1)^2 for fold"
    assert P % 128 == 0, "flattened output must be lane-dense"

    # Constant scatter matrix (built at trace time; embedded as a bf16 constant).
    S = jnp.asarray(_scatter_matrix(K, Hp, Wp, H, W), dtype=jnp.bfloat16)

    # Only wrapper glue: (n, L, c) -> (n, c, L) so the in-kernel dot is a plain
    # NN matmul with a lane-dense (L=196) minor DMA dim. No pad, no replication.
    xt = jnp.transpose(x.astype(jnp.float32), (0, 2, 1))

    out_flat = pl.pallas_call(
        _make_recon_kernel(n),
        out_shape=jax.ShapeDtypeStruct((n, c, P), jnp.float32),
        grid_spec=pltpu.PrefetchScalarGridSpec(
            num_scalar_prefetch=0,
            grid=(1,),                                          # single step
            in_specs=[
                pl.BlockSpec((n, c, L), lambda i: (0, 0, 0)),   # all batches at once
                pl.BlockSpec((L, P), lambda i: (0, 0)),         # S: one DMA, resident
            ],
            out_specs=pl.BlockSpec((n, c, P), lambda i: (0, 0, 0)),
        ),
        compiler_params=pltpu.CompilerParams(
            dimension_semantics=("arbitrary",),
        ),
    )(xt, S)

    # Free row-major reshape back to NCHW.
    return out_flat.reshape(n, c, H, W)


def _fold_reference(x, resolution, K):
    """Pure-JAX reference for the docstring pipeline (for validation)."""
    n, L, c = x.shape
    H = W = resolution
    Hp, Wp = H - K + 1, W - K + 1
    img = jnp.transpose(x, (0, 2, 1)).reshape(n, c, Hp, Wp)
    out = jnp.zeros((n, c, H, W), jnp.float32)
    for ki in range(K):
        for kj in range(K):
            out = out.at[:, :, ki:ki + Hp, kj:kj + Wp].add(img)
    return out


if __name__ == "__main__":
    n, ch, resolution, K = 2, 4, 16, 3
    Hp = Wp = resolution - K + 1
    L = Hp * Wp  # 196

    key = jax.random.PRNGKey(0)
    kx, kk = jax.random.split(key)
    x = jax.random.normal(kx, (n, L, ch), dtype=jnp.float32)
    # Round test inputs to bf16-representable values so the correctness check is
    # independent of how the MXU decomposes f32 multiplies (sums of exactly
    # representable values stay exact to f32 rounding in both kernel and ref).
    x = x.astype(jnp.bfloat16).astype(jnp.float32)
    keypoints = jax.random.normal(kk, (n, L, 1), dtype=jnp.float32)

    out = neural_normal_recon(x, keypoints, ch=ch, resolution=resolution,
                              kernel_size=K)
    out = jax.block_until_ready(out)

    assert out.shape == (n, ch, resolution, resolution)
    ref = _fold_reference(x, resolution, K)
    max_err = float(jnp.max(jnp.abs(out - ref)))
    assert max_err < 1e-4, f"mismatch vs reference: {max_err}"

    print("KERNEL_OK")
</pallas_src>

<mosaic_0001>
module attributes {stable_mosaic.version = 11 : i64} {
  func.func @recon_kernel(%arg0: i32, %arg1: memref<2x4x196xf32, #tpu.memory_space<vmem>>, %arg2: memref<196x256xbf16, #tpu.memory_space<vmem>>, %arg3: memref<2x4x256xf32, #tpu.memory_space<vmem>>) attributes {dimension_semantics = [#tpu.dimension_semantics<arbitrary>], iteration_bounds = array<i64: 1>, scalar_prefetch = 0 : i64, scratch_operands = 0 : i64, tpu.core_type = #tpu.core_type<tc>, window_params = [{pipeline_mode = #tpu.pipeline_mode<synchronous>, transform_indices = @transform_0, window_bounds = array<i64: 2, 4, 196>}, {pipeline_mode = #tpu.pipeline_mode<synchronous>, transform_indices = @transform_1, window_bounds = array<i64: 196, 256>}, {pipeline_mode = #tpu.pipeline_mode<synchronous>, transform_indices = @transform_2, window_bounds = array<i64: 2, 4, 256>}]} {
    %c0 = arith.constant 0 : index
    %c0_0 = arith.constant 0 : index
    %0 = vector.load %arg2[%c0, %c0_0] : memref<196x256xbf16, #tpu.memory_space<vmem>>, vector<196x256xbf16>
    %1 = arith.extf %0 : vector<196x256xbf16> to vector<196x256xf32>
    %c0_1 = arith.constant 0 : index
    %c0_2 = arith.constant 0 : index
    %c0_3 = arith.constant 0 : index
    %2 = vector.load %arg1[%c0_1, %c0_2, %c0_3] : memref<2x4x196xf32, #tpu.memory_space<vmem>>, vector<1x4x196xf32>
    %3 = vector.shape_cast %2 : vector<1x4x196xf32> to vector<4x196xf32>
    %cst = arith.constant dense<0.000000e+00> : vector<4x256xf32>
    %4 = tpu.matmul %3, %1, %cst {dimension_numbers = #tpu.dot_dimension_numbers<[1], [0], [0], [1], [0, 0, 1, 1], [], []>} : vector<4x196xf32>, vector<196x256xf32>, vector<4x256xf32> -> vector<4x256xf32>
    %c0_4 = arith.constant 0 : index
    %c0_5 = arith.constant 0 : index
    %c0_6 = arith.constant 0 : index
    %5 = vector.load %arg3[%c0_4, %c0_5, %c0_6] : memref<2x4x256xf32, #tpu.memory_space<vmem>>, vector<1x4x256xf32>
    %6 = vector.shape_cast %5 : vector<1x4x256xf32> to vector<4x256xf32>
    %7 = vector.shape_cast %4 : vector<4x256xf32> to vector<1x4x256xf32>
    tpu.vector_store %arg3[%c0_4, %c0_5, %c0_6], %7 {strides = array<i32>} : memref<2x4x256xf32, #tpu.memory_space<vmem>>, vector<1x4x256xf32>,
    %c1 = arith.constant 1 : index
    %c0_7 = arith.constant 0 : index
    %c0_8 = arith.constant 0 : index
    %8 = vector.load %arg1[%c1, %c0_7, %c0_8] : memref<2x4x196xf32, #tpu.memory_space<vmem>>, vector<1x4x196xf32>
    %9 = vector.shape_cast %8 : vector<1x4x196xf32> to vector<4x196xf32>
    %cst_9 = arith.constant dense<0.000000e+00> : vector<4x256xf32>
    %10 = tpu.matmul %9, %1, %cst_9 {dimension_numbers = #tpu.dot_dimension_numbers<[1], [0], [0], [1], [0, 0, 1, 1], [], []>} : vector<4x196xf32>, vector<196x256xf32>, vector<4x256xf32> -> vector<4x256xf32>
    %c1_10 = arith.constant 1 : index
    %c0_11 = arith.constant 0 : index
    %c0_12 = arith.constant 0 : index
    %11 = vector.load %arg3[%c1_10, %c0_11, %c0_12] : memref<2x4x256xf32, #tpu.memory_space<vmem>>, vector<1x4x256xf32>
    %12 = vector.shape_cast %11 : vector<1x4x256xf32> to vector<4x256xf32>
    %13 = vector.shape_cast %10 : vector<4x256xf32> to vector<1x4x256xf32>
    tpu.vector_store %arg3[%c1_10, %c0_11, %c0_12], %13 {strides = array<i32>} : memref<2x4x256xf32, #tpu.memory_space<vmem>>, vector<1x4x256xf32>,
    return
  }
  func.func @transform_0(%arg0: i32) -> (i32, i32, i32) {
    %c0_i32 = arith.constant 0 : i32
    %c0_i32_0 = arith.constant 0 : i32
    %c0_i32_1 = arith.constant 0 : i32
    %c0_i32_2 = arith.constant 0 : i32
    return %c0_i32, %c0_i32_0, %c0_i32_1 : i32, i32, i32
  }
  func.func @transform_1(%arg0: i32) -> (i32, i32) {
    %c0_i32 = arith.constant 0 : i32
    %c0_i32_0 = arith.constant 0 : i32
    %c0_i32_1 = arith.constant 0 : i32
    return %c0_i32, %c0_i32_0 : i32, i32
  }
  func.func @transform_2(%arg0: i32) -> (i32, i32, i32) {
    %c0_i32 = arith.constant 0 : i32
    %c0_i32_0 = arith.constant 0 : i32
    %c0_i32_1 = arith.constant 0 : i32
    %c0_i32_2 = arith.constant 0 : i32
    return %c0_i32, %c0_i32_0, %c0_i32_1 : i32, i32, i32
  }
}

</mosaic_0001>

<bundles_post_ra>
// kernel: neural_normal_recon.1
= control target key start
LH: loop header
LB: loop body
LE: loop exit
PB: predicated region body
PF: predicated region fallthrough
CT: control target
= control target key end

     0   :  { %7 = vsyncpa [#allocation3], 0  ;;  %s380_s0 = inlined_call_operand.hbm [shape: f32[2,4,196], index: 0, kind: input, shape index: {}]   ;;  %s381_s1 = inlined_call_operand.hbm [shape: bf16[196,256], index: 1, kind: input, shape index: {}]   ;;  %s382_s2 = inlined_call_operand.vmem [shape: f32[2,4,256], index: 2, kind: output, shape index: {}]  }
   0x1   :  { %8 = vsyncpa [#allocation5], 0  ;;  %s349_s9 = smov [#allocation2]  }
   0x2   :  { %s14_s10 = sshll.u32 %s349_s9, 4  ;;  %s15_s10 = int_to_ptr.vmem [resolvable:$true] %s14_s10 }
   0x3   :  { %s313_s11 = scalar_lea.vmem %s15_s10, 256  ;;  %p318_p1 = scmp.lt.s32.totalorder %s15_s10, %s15_s10 }
   0x4   :  { %p314_p0 = scmp.ne.s32.totalorder %s15_s10, %s313_s11  ;;  %p319_p2 = scmp.lt.s32.totalorder %s313_s11, %s313_s11 }
   0x6   :  { %p320_p3 = por %p319_p2, %p318_p1 }
   0x8   :  { %p321_p4 = pnand %p320_p3, %p314_p0 }
   0xa   :  { %324 = shalt.err (!%p321_p4)
}
   0xb   :  { %s350_s12 = smov 128   ;;  %s351_s13 = smov 8  }
   0xc   :  { %20 = dma.hbm_to_vmem [thread:$0]  %s380_s0, 256, %s15_s10, [#allocation3], %s350_s12, %s350_s12, %s351_s13  }
   0xd   :  { %s352_s16 = smov [#allocation4]  }
   0xe   :  { %s26_s17 = sshll.u32 %s352_s16, 4  ;;  %s27_s17 = int_to_ptr.vmem [resolvable:$true] %s26_s17 }
   0xf   :  { %s333_s18 = scalar_lea.vmem %s27_s17, 3200  ;;  %p338_p6 = scmp.lt.s32.totalorder %s27_s17, %s27_s17 }
  0x10   :  { %p334_p5 = scmp.ne.s32.totalorder %s27_s17, %s333_s18  ;;  %p339_p7 = scmp.lt.s32.totalorder %s333_s18, %s333_s18 }
  0x12   :  { %p340_p8 = por %p339_p7, %p338_p6 }
  0x14   :  { %p341_p9 = pnand %p340_p8, %p334_p5 }
  0x16   :  { %344 = shalt.err (!%p341_p9)
}
  0x17   :  { %32 = dma.hbm_to_vmem [thread:$0]  %s381_s1, 3200, %s27_s17, [#allocation5], %s350_s12, %s350_s12, %s351_s13  }
  0x18   :  { %345 = dma.done.wait [#allocation3], 256  }
  0x19   :  { %346 = vsyncadd [#allocation3], 4294967040 }
  0x1a   :  { %347 = dma.done.wait [#allocation5], 3200  }
  0x1b   :  { %348 = vsyncadd [#allocation5], 4294964096  ;;  %v54_v0 = vld [vmem:[#allocation4 + $0x78] sm:$0xff]  ;;  %v53_v1 = vld [vmem:[#allocation4 + $0x70] sm:$0xff]  ;;  %vm120_vm0 = vcmask 1043456   ;;  %vm117_vm1 = vcmask 556032  }
  0x1c   :  { %v52_v2 = vld [vmem:[#allocation4 + $0x68] sm:$0xff]  ;;  %v95_v3 = vunpack.c.h.bf16 %v54_v0  ;;  %v94_v4 = vunpack.c.l.bf16 %v54_v0  ;;  %v93_v5 = vunpack.c.h.bf16 %v53_v1  ;;  %v92_v6 = vunpack.c.l.bf16 %v53_v1  ;;  %v51_v7 = vld [vmem:[#allocation4 + $0x60] sm:$0xff]  ;;  %v50_v10 = vld [vmem:[#allocation4 + $0x58] sm:$0xff] }
  0x1d   :  { %v91_v8 = vunpack.c.h.bf16 %v52_v2  ;;  %v90_v9 = vunpack.c.l.bf16 %v52_v2  ;;  %v89_v11 = vunpack.c.h.bf16 %v51_v7  ;;  %v88_v12 = vunpack.c.l.bf16 %v51_v7  ;;  %v49_v13 = vld [vmem:[#allocation4 + $0x50] sm:$0xff]  ;;  %v48_v16 = vld [vmem:[#allocation4 + $0x48] sm:$0xff]  ;;  %v47_v19 = vld [vmem:[#allocation4 + $0x40] sm:$0xff] }
  0x1e   :  { %127 = vmatprep.subr.mxu0 %v95_v3  ;;  %209 = vmatprep.subr.mxu1 %v95_v3  ;;  %v87_v14 = vunpack.c.h.bf16 %v50_v10  ;;  %v86_v15 = vunpack.c.l.bf16 %v50_v10  ;;  %v85_v17 = vunpack.c.h.bf16 %v49_v13  ;;  %v84_v18 = vunpack.c.l.bf16 %v49_v13  ;;  %v46_v22 = vld [vmem:[#allocation4 + $0x38] sm:$0xff]  ;;  %v45_v25 = vld [vmem:[#allocation4 + $0x30] sm:$0xff]  ;;  %v44_v28 = vld [vmem:[#allocation4 + $0x28] sm:$0xff] }
  0x1f   :  { %128 = vmatpush1.msra.mxu0 %v94_v4  ;;  %210 = vmatpush1.msra.mxu1 %v94_v4  ;;  %v83_v20 = vunpack.c.h.bf16 %v48_v16  ;;  %v82_v21 = vunpack.c.l.bf16 %v48_v16  ;;  %v81_v23 = vunpack.c.h.bf16 %v47_v19  ;;  %v80_v24 = vunpack.c.l.bf16 %v47_v19  ;;  %v43_v31 = vld [vmem:[#allocation4 + $0x20] sm:$0xff]  ;;  %v42_v34 = vld [vmem:[#allocation4 + $0x18] sm:$0xff]  ;;  %v41_v37 = vld [vmem:[#allocation4 + $0x10] sm:$0xff] }
  0x20   :  { %129 = vmatprep.subr.mxu0 %v93_v5  ;;  %211 = vmatprep.subr.mxu1 %v93_v5  ;;  %v79_v26 = vunpack.c.h.bf16 %v46_v22  ;;  %v78_v27 = vunpack.c.l.bf16 %v46_v22  ;;  %v77_v29 = vunpack.c.h.bf16 %v45_v25  ;;  %v76_v30 = vunpack.c.l.bf16 %v45_v25  ;;  %v40_v40 = vld [vmem:[#allocation4 + $0x8] sm:$0xff]  ;;  %v39_v43 = vld [vmem:[#allocation4] sm:$0xff]  ;;  %v62_v49 = vld [vmem:[#allocation4 + $0xb8] sm:$0xff] }
  0x21   :  { %130 = vmatpush1.msra.mxu0 %v92_v6  ;;  %212 = vmatpush1.msra.mxu1 %v92_v6  ;;  %v75_v32 = vunpack.c.h.bf16 %v44_v28  ;;  %v74_v33 = vunpack.c.l.bf16 %v44_v28  ;;  %v73_v35 = vunpack.c.h.bf16 %v43_v31  ;;  %v72_v36 = vunpack.c.l.bf16 %v43_v31  ;;  %v63_v46 = vld [vmem:[#allocation4 + $0xc0] sm:$0x33]  ;;  %v61_v52 = vld [vmem:[#allocation4 + $0xb0] sm:$0xff]  ;;  %v60_v55 = vld [vmem:[#allocation4 + $0xa8] sm:$0xff] }
  0x22   :  { %131 = vmatprep.subr.mxu0 %v91_v8  ;;  %213 = vmatprep.subr.mxu1 %v91_v8  ;;  %v71_v38 = vunpack.c.h.bf16 %v42_v34  ;;  %v70_v39 = vunpack.c.l.bf16 %v42_v34  ;;  %v69_v41 = vunpack.c.h.bf16 %v41_v37  ;;  %v68_v42 = vunpack.c.l.bf16 %v41_v37  ;;  %v59_v58 = vld [vmem:[#allocation4 + $0xa0] sm:$0xff]  ;;  %v58_v61 = vld [vmem:[#allocation4 + $0x98] sm:$0xff]  ;;  %v57_v0 = vld [vmem:[#allocation4 + $0x90] sm:$0xff] }
  0x23   :  { %132 = vmatpush1.msra.mxu0 %v90_v9  ;;  %214 = vmatpush1.msra.mxu1 %v90_v9  ;;  %v67_v44 = vunpack.c.h.bf16 %v40_v40  ;;  %v66_v45 = vunpack.c.l.bf16 %v40_v40  ;;  %v65_v47 = vunpack.c.h.bf16 %v39_v43  ;;  %v64_v48 = vunpack.c.l.bf16 %v39_v43  ;;  %v56_v3 = vld [vmem:[#allocation4 + $0x88] sm:$0xff]  ;;  %v55_v6 = vld [vmem:[#allocation4 + $0x80] sm:$0xff]  ;;  %v114_v8 = vld [vmem:[#allocation2] sm:$0xff] }
  0x24   :  { %133 = vmatprep.subr.mxu0 %v89_v11  ;;  %215 = vmatprep.subr.mxu1 %v89_v11  ;;  %v113_v50 = vunpack.c.h.bf16 %v63_v46  ;;  %v112_v51 = vunpack.c.l.bf16 %v63_v46  ;;  %v111_v53 = vunpack.c.h.bf16 %v62_v49  ;;  %v110_v54 = vunpack.c.l.bf16 %v62_v49  ;;  %v204_v10 = vld [vmem:[#allocation2 + $0x8] sm:$0xff] }
  0x25   :  { %134 = vmatpush1.msra.mxu0 %v88_v12  ;;  %216 = vmatpush1.msra.mxu1 %v88_v12  ;;  %v109_v56 = vunpack.c.h.bf16 %v61_v52  ;;  %v108_v57 = vunpack.c.l.bf16 %v61_v52  ;;  %v107_v59 = vunpack.c.h.bf16 %v60_v55  ;;  %v106_v60 = vunpack.c.l.bf16 %v60_v55 }
  0x26   :  { %135 = vmatprep.subr.mxu0 %v87_v14  ;;  %217 = vmatprep.subr.mxu1 %v87_v14  ;;  %v105_v62 = vunpack.c.h.bf16 %v59_v58  ;;  %v104_v63 = vunpack.c.l.bf16 %v59_v58  ;;  %v103_v1 = vunpack.c.h.bf16 %v58_v61  ;;  %v102_v2 = vunpack.c.l.bf16 %v58_v61 }
  0x27   :  { %136 = vmatpush1.msra.mxu0 %v86_v15  ;;  %218 = vmatpush1.msra.mxu1 %v86_v15  ;;  %v101_v4 = vunpack.c.h.bf16 %v57_v0  ;;  %v100_v5 = vunpack.c.l.bf16 %v57_v0  ;;  %v99_v7 = vunpack.c.h.bf16 %v56_v3  ;;  %v98_v9 = vunpack.c.l.bf16 %v56_v3 }
  0x28   :  { %137 = vmatprep.subr.mxu0 %v85_v17  ;;  %219 = vmatprep.subr.mxu1 %v85_v17  ;;  %v97_v11 = vunpack.c.h.bf16 %v55_v6  ;;  %v96_v12 = vunpack.c.l.bf16 %v55_v6  ;;  %v116_v13 = vcombine.high %v114_v8, %v114_v8  ;;  %v206_v14 = vcombine.high %v204_v10, %v204_v10 }
  0x29   :  { %138 = vmatpush1.msra.mxu0 %v84_v18  ;;  %220 = vmatpush1.msra.mxu1 %v84_v18 }
  0x2a   :  { %139 = vmatprep.subr.mxu0 %v83_v20  ;;  %221 = vmatprep.subr.mxu1 %v83_v20 }
  0x2b   :  { %140 = vmatpush1.msra.mxu0 %v82_v21  ;;  %222 = vmatpush1.msra.mxu1 %v82_v21 }
  0x2c   :  { %141 = vmatprep.subr.mxu0 %v81_v23  ;;  %223 = vmatprep.subr.mxu1 %v81_v23 }
  0x2d   :  { %142 = vmatpush1.msra.mxu0 %v80_v24  ;;  %224 = vmatpush1.msra.mxu1 %v80_v24 }
  0x2e   :  { %143 = vmatprep.subr.mxu0 %v79_v26  ;;  %225 = vmatprep.subr.mxu1 %v79_v26 }
  0x2f   :  { %144 = vmatpush1.msra.mxu0 %v78_v27  ;;  %226 = vmatpush1.msra.mxu1 %v78_v27 }
  0x30   :  { %145 = vmatprep.subr.mxu0 %v77_v29  ;;  %227 = vmatprep.subr.mxu1 %v77_v29 }
  0x31   :  { %146 = vmatpush1.msra.mxu0 %v76_v30  ;;  %228 = vmatpush1.msra.mxu1 %v76_v30 }
  0x32   :  { %147 = vmatprep.subr.mxu0 %v75_v32  ;;  %229 = vmatprep.subr.mxu1 %v75_v32 }
  0x33   :  { %148 = vmatpush1.msra.mxu0 %v74_v33  ;;  %230 = vmatpush1.msra.mxu1 %v74_v33 }
  0x34   :  { %149 = vmatprep.subr.mxu0 %v73_v35  ;;  %231 = vmatprep.subr.mxu1 %v73_v35 }
  0x35   :  { %150 = vmatpush1.msra.mxu0 %v72_v36  ;;  %232 = vmatpush1.msra.mxu1 %v72_v36 }
  0x36   :  { %151 = vmatprep.subr.mxu0 %v71_v38  ;;  %233 = vmatprep.subr.mxu1 %v71_v38 }
  0x37   :  { %152 = vmatpush1.msra.mxu0 %v70_v39  ;;  %234 = vmatpush1.msra.mxu1 %v70_v39 }
  0x38   :  { %153 = vmatprep.subr.mxu0 %v69_v41  ;;  %235 = vmatprep.subr.mxu1 %v69_v41 }
  0x39   :  { %154 = vmatpush1.msra.mxu0 %v68_v42  ;;  %236 = vmatpush1.msra.mxu1 %v68_v42 }
  0x3a   :  { %155 = vmatprep.subr.mxu0 %v67_v44  ;;  %237 = vmatprep.subr.mxu1 %v67_v44 }
  0x3b   :  { %156 = vmatpush1.msra.mxu0 %v66_v45  ;;  %238 = vmatpush1.msra.mxu1 %v66_v45 }
  0x3c   :  { %157 = vmatprep.subr.mxu0 %v65_v47  ;;  %239 = vmatprep.subr.mxu1 %v65_v47 }
  0x3d   :  { %158 = vmatpush1.msra.mxu0 %v64_v48  ;;  %240 = vmatpush1.msra.mxu1 %v64_v48 }
  0x3e   :  { %292 = vmatprep.subr.msk.mxu0 %vm120_vm0, %v113_v50  ;;  %295 = vmatprep.subr.msk.mxu1 %vm120_vm0, %v113_v50 }
  0x3f   :  { %293 = vmatpush2.msk.msra.mxu0 %vm120_vm0, %v112_v51  ;;  %296 = vmatpush2.msk.msra.mxu1 %vm120_vm0, %v112_v51 }
  0x40   :  { %175 = vmatprep.subr.mxu0 %v111_v53  ;;  %257 = vmatprep.subr.mxu1 %v111_v53 }
  0x41   :  { %176 = vmatpush2.msra.mxu0 %v110_v54  ;;  %258 = vmatpush2.msra.mxu1 %v110_v54 }
  0x42   :  { %177 = vmatprep.subr.mxu0 %v109_v56  ;;  %259 = vmatprep.subr.mxu1 %v109_v56 }
  0x43   :  { %178 = vmatpush2.msra.mxu0 %v108_v57  ;;  %260 = vmatpush2.msra.mxu1 %v108_v57 }
  0x44   :  { %179 = vmatprep.subr.mxu0 %v107_v59  ;;  %261 = vmatprep.subr.mxu1 %v107_v59 }
  0x45   :  { %180 = vmatpush2.msra.mxu0 %v106_v60  ;;  %262 = vmatpush2.msra.mxu1 %v106_v60 }
  0x46   :  { %181 = vmatprep.subr.mxu0 %v105_v62  ;;  %263 = vmatprep.subr.mxu1 %v105_v62 }
  0x47   :  { %182 = vmatpush2.msra.mxu0 %v104_v63  ;;  %264 = vmatpush2.msra.mxu1 %v104_v63 }
  0x48   :  { %183 = vmatprep.subr.mxu0 %v103_v1  ;;  %265 = vmatprep.subr.mxu1 %v103_v1 }
  0x49   :  { %184 = vmatpush2.msra.mxu0 %v102_v2  ;;  %266 = vmatpush2.msra.mxu1 %v102_v2 }
  0x4a   :  { %185 = vmatprep.subr.mxu0 %v101_v4  ;;  %267 = vmatprep.subr.mxu1 %v101_v4 }
  0x4b   :  { %186 = vmatpush2.msra.mxu0 %v100_v5  ;;  %268 = vmatpush2.msra.mxu1 %v100_v5 }
  0x4c   :  { %187 = vmatprep.subr.mxu0 %v99_v7  ;;  %269 = vmatprep.subr.mxu1 %v99_v7 }
  0x4d   :  { %188 = vmatpush2.msra.mxu0 %v98_v9  ;;  %270 = vmatpush2.msra.mxu1 %v98_v9 }
  0x4e   :  { %189 = vmatprep.subr.mxu0 %v97_v11  ;;  %271 = vmatprep.subr.mxu1 %v97_v11 }
  0x4f   :  { %190 = vmatpush2.msra.mxu0 %v96_v12  ;;  %294 = vmatprep.mubr.msk.f32.mxu0 %vm117_vm1, %v116_v13 }
  0x50   :  { %272 = vmatpush2.msra.mxu1 %v96_v12  ;;  %297 = vmatprep.mubr.msk.f32.mxu1 %vm117_vm1, %v206_v14 }
  0x51   :  { %192 = vmatmul.mubr.f32.vlgmr.msra.gmra.mxu0 %v114_v8  ;;  %274 = vmatmul.mubr.f32.vlgmr.msra.gmra.mxu1 %v204_v10 }
 0x111   :  { %v193_v15 = vpop.f32.mrf.mxu0  ;;  %v275_v16 = vpop.f32.mrf.mxu1 }
 0x113   :  { %v195_v17 = vpop.f32.mrf.mxu0  ;;  %v277_v18 = vpop.f32.mrf.mxu1 }
 0x114   :  { %v200_v19 = vcombine.low %v193_v15, %v195_v17  ;;  %v282_v20 = vcombine.low %v275_v16, %v277_v18 }
 0x116   :  { %202 = vst [vmem:[%s382_s2] sm:$0xff] %v200_v19  ;;  %298 = vst [vmem:[%s382_s2 + $0x8] sm:$0xff] %v282_v20 }
 0x117   :  { %290 = vsyncpa [#allocation3], 1 }
 0x118   :  { %291 = vsyncpa [#allocation5], 1 }

</bundles_post_ra>
